<compile_context>
chip_gen: v6e
topology: v6e:2x2x1
jax: 0.10.0
libtpu: 0.0.40
codegen_flags: <defaults>
</compile_context>

<pallas_src>
import jax
import jax.numpy as jnp
from jax.experimental import pallas as pl
from jax.experimental.pallas import tpu as pltpu


def _round_up(n, m):
    return ((n + m - 1) // m) * m


def _mlp_kernel(x_ref, w1_ref, b1_ref, w2_ref, b2_ref,
                w3_ref, b3_ref, w4_ref, b4_ref, o_ref):
    # x tile: (TILE_B, D), batch on sublanes / features on lanes.
    # Cast to bf16 in-kernel (VPU) instead of a separate wrapper XLA pass.
    x = x_ref[...].astype(jnp.bfloat16)

    # Layer 1: h1[f, b] = sum_k W1[f, k] * x[b, k]  -> (16, TILE_B).
    # bf16 operands, f32 MXU accumulation.
    h = jax.lax.dot_general(
        w1_ref[...], x,
        dimension_numbers=(((1,), (1,)), ((), ())),
        preferred_element_type=jnp.float32)
    h = jnp.maximum(h + b1_ref[...], 0.0)          # (16,1) bias broadcasts on lanes

    # Layer 2: (8, 16) @ (16, TILE_B) -> (8, TILE_B); bf16 passes, f32 acc.
    h = jnp.dot(w2_ref[...], h.astype(jnp.bfloat16),
                preferred_element_type=jnp.float32)
    h = jnp.maximum(h + b2_ref[...], 0.0)

    # Layer 3: (4, 8) @ (8, TILE_B) -> (4, TILE_B); bf16 passes, f32 acc.
    h = jnp.dot(w3_ref[...], h.astype(jnp.bfloat16),
                preferred_element_type=jnp.float32)
    h = jnp.maximum(h + b3_ref[...], 0.0)

    # Layer 4 (4 -> 1): VPU multiply + sublane reduce (skip an N=1 MXU matmul).
    out = jnp.sum(h * w4_ref[...], axis=0, keepdims=True) + b4_ref[...]
    o_ref[...] = out                                # (1, TILE_B) lane-dense store


def _pick_tile_b(B, D, x_itemsize):
    """VMEM-budgeted batch tile + scoped-VMEM limit, per TPU generation."""
    try:
        vmem_cap = int(pltpu.get_tpu_info().vmem_capacity_bytes)
    except Exception:
        vmem_cap = 64 << 20                      # conservative (v7x) fallback
    vmem_limit = int(min(vmem_cap * 3 // 4, 96 << 20))

    # Per-row VMEM bytes: x double-buffered in its native dtype, in-kernel bf16
    # copies (cast + possible relayout), f32/bf16 intermediates, padded output
    # row (double-buffered).  Use half the limit as the working budget.
    per_row = 2 * D * x_itemsize + 2 * (D * 2) + 256
    budget = vmem_limit // 2
    tile_b = budget // max(per_row, 1)
    tile_b = min(tile_b, 32768)                  # diminishing returns beyond ~32K
    tile_b = max(128, (tile_b // 128) * 128)
    tile_b = min(tile_b, _round_up(B, 128))      # don't exceed (rounded) batch

    # v7x megacore: "parallel" only shards across the 2 TCs with >= 2 steps.
    if B > 128 and -(-B // tile_b) < 2:
        tile_b = max(128, _round_up(-(-B // 2), 128))
    return tile_b, vmem_limit


def my_model_forward(x, params, *, tile_b=None):
    """Forward pass matching My_Model.forward: (B, D) -> (B,).

    params are PyTorch-layout: [(W (out,in), b (out,)), ...] for the 4 Linears.
    """
    B, D = x.shape
    (w1, b1), (w2, b2), (w3, b3), (w4, b4) = params

    auto_tile, vmem_limit = _pick_tile_b(B, D, x.dtype.itemsize)
    if tile_b is None:
        tile_b = auto_tile
    else:
        tile_b = max(128, _round_up(int(tile_b), 128))
    grid = (pl.cdiv(B, tile_b),)

    # Weight/bias casts are tiny one-off ops; the HBM-dominant x is passed
    # through untouched (cast to bf16 inside the kernel).
    args = (
        x,
        w1.astype(jnp.bfloat16), b1.astype(jnp.float32).reshape(-1, 1),
        w2.astype(jnp.bfloat16), b2.astype(jnp.float32).reshape(-1, 1),
        w3.astype(jnp.bfloat16), b3.astype(jnp.float32).reshape(-1, 1),
        w4.astype(jnp.float32).reshape(-1, 1),       # (4, 1) column
        b4.astype(jnp.float32).reshape(1, 1),        # (1, 1) scalar
    )

    # x tiled over the batch grid; weights/biases use constant block indices so
    # they are DMA'd once and stay VMEM-resident (the pipeline streams x only).
    in_specs = [
        pl.BlockSpec((tile_b, D), lambda i: (i, 0)),   # x (native dtype)
        pl.BlockSpec((16, D), lambda i: (0, 0)),       # W1 (bf16)
        pl.BlockSpec((16, 1), lambda i: (0, 0)),       # b1
        pl.BlockSpec((8, 16), lambda i: (0, 0)),       # W2 (bf16)
        pl.BlockSpec((8, 1), lambda i: (0, 0)),        # b2
        pl.BlockSpec((4, 8), lambda i: (0, 0)),        # W3 (bf16)
        pl.BlockSpec((4, 1), lambda i: (0, 0)),        # b3
        pl.BlockSpec((4, 1), lambda i: (0, 0)),        # W4 (column)
        pl.BlockSpec((1, 1), lambda i: (0, 0)),        # b4
    ]

    out = pl.pallas_call(
        _mlp_kernel,
        out_shape=jax.ShapeDtypeStruct((1, B), jnp.float32),
        grid=grid,
        in_specs=in_specs,
        out_specs=pl.BlockSpec((1, tile_b), lambda i: (0, i)),
        compiler_params=pltpu.CompilerParams(
            dimension_semantics=("parallel",),
            vmem_limit_bytes=vmem_limit),
    )(*args)

    # x.squeeze(1) in the PyTorch module: single output feature -> (B,).
    # (Partial last block: columns beyond B were never written back by Pallas.)
    return out[0, :B]


def init_params(key, input_dim):
    """Deterministic PyTorch-layout params ((out,in) weights, fan-in uniform)."""
    dims = [(16, input_dim), (8, 16), (4, 8), (1, 4)]   # (out, in)
    params = []
    for (fan_out, fan_in) in dims:
        key, kw, kb = jax.random.split(key, 3)
        bound = 1.0 / jnp.sqrt(fan_in)
        w = jax.random.uniform(kw, (fan_out, fan_in), jnp.float32, -bound, bound)
        b = jax.random.uniform(kb, (fan_out,), jnp.float32, -bound, bound)
        params.append((w, b))
    return params


def reference_forward(x, params):
    """Pure-JAX reference mirroring the kernel's bf16 passes / f32 accumulation."""
    (w1, b1), (w2, b2), (w3, b3), (w4, b4) = params
    f32 = jnp.float32
    h = jnp.dot(x.astype(jnp.bfloat16), w1.astype(jnp.bfloat16).T,
                preferred_element_type=f32)
    h = jnp.maximum(h + b1, 0.0)
    h = jnp.dot(h.astype(jnp.bfloat16), w2.astype(jnp.bfloat16).T,
                preferred_element_type=f32)
    h = jnp.maximum(h + b2, 0.0)
    h = jnp.dot(h.astype(jnp.bfloat16), w3.astype(jnp.bfloat16).T,
                preferred_element_type=f32)
    h = jnp.maximum(h + b3, 0.0)
    out = h @ w4.astype(f32).T + b4
    return out[:, 0]


if __name__ == "__main__":
    key = jax.random.PRNGKey(0)
    key, kx = jax.random.split(key)

    # Small, module-consistent shapes.
    batch, input_dim = 8, 32
    x = jax.random.normal(kx, (batch, input_dim), jnp.float32)
    params = init_params(key, input_dim)

    y = my_model_forward(x, params)
    jax.block_until_ready(y)
    y_ref = reference_forward(x, params)
    assert y.shape == (batch,)
    assert jnp.allclose(y, y_ref, atol=2e-2, rtol=2e-2)

    # Multi-step grid (>= 2 steps for megacore) plus a partial last block.
    key, kx2 = jax.random.split(key)
    x2 = jax.random.normal(kx2, (300, input_dim), jnp.float32)
    y2 = my_model_forward(x2, params)
    jax.block_until_ready(y2)
    y2_ref = reference_forward(x2, params)
    assert y2.shape == (300,)
    assert jnp.allclose(y2, y2_ref, atol=2e-2, rtol=2e-2)

    print("KERNEL_OK")
</pallas_src>

<mosaic_0001>
module attributes {stable_mosaic.version = 11 : i64} {
  func.func @_mlp_kernel(%arg0: i32, %arg1: memref<128x32xf32, #tpu.memory_space<vmem>>, %arg2: memref<16x32xbf16, #tpu.memory_space<vmem>>, %arg3: memref<16x1xf32, #tpu.memory_space<vmem>>, %arg4: memref<8x16xbf16, #tpu.memory_space<vmem>>, %arg5: memref<8x1xf32, #tpu.memory_space<vmem>>, %arg6: memref<4x8xbf16, #tpu.memory_space<vmem>>, %arg7: memref<4x1xf32, #tpu.memory_space<vmem>>, %arg8: memref<4x1xf32, #tpu.memory_space<vmem>>, %arg9: memref<1x1xf32, #tpu.memory_space<vmem>>, %arg10: memref<1x128xf32, #tpu.memory_space<vmem>>) attributes {dimension_semantics = [#tpu.dimension_semantics<parallel>], iteration_bounds = array<i64: 1>, scalar_prefetch = 0 : i64, scratch_operands = 0 : i64, tpu.core_type = #tpu.core_type<tc>, window_params = [{transform_indices = @transform_0, window_bounds = array<i64: 128, 32>}, {pipeline_mode = #tpu.pipeline_mode<synchronous>, transform_indices = @transform_1, window_bounds = array<i64: 16, 32>}, {pipeline_mode = #tpu.pipeline_mode<synchronous>, transform_indices = @transform_2, window_bounds = array<i64: 16, 1>}, {pipeline_mode = #tpu.pipeline_mode<synchronous>, transform_indices = @transform_3, window_bounds = array<i64: 8, 16>}, {pipeline_mode = #tpu.pipeline_mode<synchronous>, transform_indices = @transform_4, window_bounds = array<i64: 8, 1>}, {pipeline_mode = #tpu.pipeline_mode<synchronous>, transform_indices = @transform_5, window_bounds = array<i64: 4, 8>}, {pipeline_mode = #tpu.pipeline_mode<synchronous>, transform_indices = @transform_6, window_bounds = array<i64: 4, 1>}, {pipeline_mode = #tpu.pipeline_mode<synchronous>, transform_indices = @transform_7, window_bounds = array<i64: 4, 1>}, {pipeline_mode = #tpu.pipeline_mode<synchronous>, transform_indices = @transform_8, window_bounds = array<i64: 1, 1>}, {transform_indices = @transform_9, window_bounds = array<i64: 1, 128>}]} {
    %c0 = arith.constant 0 : index
    %c0_0 = arith.constant 0 : index
    %0 = vector.load %arg1[%c0, %c0_0] : memref<128x32xf32, #tpu.memory_space<vmem>>, vector<128x32xf32>
    %1 = arith.truncf %0 : vector<128x32xf32> to vector<128x32xbf16>
    %c0_1 = arith.constant 0 : index
    %c0_2 = arith.constant 0 : index
    %2 = vector.load %arg2[%c0_1, %c0_2] : memref<16x32xbf16, #tpu.memory_space<vmem>>, vector<16x32xbf16>
    %cst = arith.constant dense<0.000000e+00> : vector<16x128xf32>
    %3 = tpu.matmul %2, %1, %cst {dimension_numbers = #tpu.dot_dimension_numbers<[1], [1], [0], [0], [0, 0, 1, 0], [], []>} : vector<16x32xbf16>, vector<128x32xbf16>, vector<16x128xf32> -> vector<16x128xf32>
    %c0_3 = arith.constant 0 : index
    %c0_4 = arith.constant 0 : index
    %4 = vector.load %arg3[%c0_3, %c0_4] : memref<16x1xf32, #tpu.memory_space<vmem>>, vector<16x1xf32>
    %5 = vector.broadcast %4 : vector<16x1xf32> to vector<16x128xf32>
    %6 = arith.addf %3, %5 : vector<16x128xf32>
    %cst_5 = arith.constant 0.000000e+00 : f32
    %7 = vector.broadcast %cst_5 : f32 to vector<16x128xf32>
    %8 = arith.maximumf %6, %7 : vector<16x128xf32>
    %c0_6 = arith.constant 0 : index
    %c0_7 = arith.constant 0 : index
    %9 = vector.load %arg4[%c0_6, %c0_7] : memref<8x16xbf16, #tpu.memory_space<vmem>>, vector<8x16xbf16>
    %10 = arith.truncf %8 : vector<16x128xf32> to vector<16x128xbf16>
    %cst_8 = arith.constant dense<0.000000e+00> : vector<8x128xf32>
    %11 = tpu.matmul %9, %10, %cst_8 {dimension_numbers = #tpu.dot_dimension_numbers<[1], [0], [0], [1], [0, 0, 1, 1], [], []>} : vector<8x16xbf16>, vector<16x128xbf16>, vector<8x128xf32> -> vector<8x128xf32>
    %c0_9 = arith.constant 0 : index
    %c0_10 = arith.constant 0 : index
    %12 = vector.load %arg5[%c0_9, %c0_10] : memref<8x1xf32, #tpu.memory_space<vmem>>, vector<8x1xf32>
    %13 = vector.broadcast %12 : vector<8x1xf32> to vector<8x128xf32>
    %14 = arith.addf %11, %13 : vector<8x128xf32>
    %cst_11 = arith.constant 0.000000e+00 : f32
    %15 = vector.broadcast %cst_11 : f32 to vector<8x128xf32>
    %16 = arith.maximumf %14, %15 : vector<8x128xf32>
    %c0_12 = arith.constant 0 : index
    %c0_13 = arith.constant 0 : index
    %17 = vector.load %arg6[%c0_12, %c0_13] : memref<4x8xbf16, #tpu.memory_space<vmem>>, vector<4x8xbf16>
    %18 = arith.truncf %16 : vector<8x128xf32> to vector<8x128xbf16>
    %cst_14 = arith.constant dense<0.000000e+00> : vector<4x128xf32>
    %19 = tpu.matmul %17, %18, %cst_14 {dimension_numbers = #tpu.dot_dimension_numbers<[1], [0], [0], [1], [0, 0, 1, 1], [], []>} : vector<4x8xbf16>, vector<8x128xbf16>, vector<4x128xf32> -> vector<4x128xf32>
    %c0_15 = arith.constant 0 : index
    %c0_16 = arith.constant 0 : index
    %20 = vector.load %arg7[%c0_15, %c0_16] : memref<4x1xf32, #tpu.memory_space<vmem>>, vector<4x1xf32>
    %21 = vector.broadcast %20 : vector<4x1xf32> to vector<4x128xf32>
    %22 = arith.addf %19, %21 : vector<4x128xf32>
    %cst_17 = arith.constant 0.000000e+00 : f32
    %23 = vector.broadcast %cst_17 : f32 to vector<4x128xf32>
    %24 = arith.maximumf %22, %23 : vector<4x128xf32>
    %c0_18 = arith.constant 0 : index
    %c0_19 = arith.constant 0 : index
    %25 = vector.load %arg8[%c0_18, %c0_19] : memref<4x1xf32, #tpu.memory_space<vmem>>, vector<4x1xf32>
    %26 = vector.broadcast %25 : vector<4x1xf32> to vector<4x128xf32>
    %27 = arith.mulf %24, %26 : vector<4x128xf32>
    %cst_20 = arith.constant dense<0.000000e+00> : vector<128xf32>
    %28 = vector.multi_reduction <add>, %27, %cst_20 [0] : vector<4x128xf32> to vector<128xf32>
    %29 = vector.shape_cast %28 : vector<128xf32> to vector<1x128xf32>
    %c0_21 = arith.constant 0 : index
    %c0_22 = arith.constant 0 : index
    %30 = vector.load %arg9[%c0_21, %c0_22] : memref<1x1xf32, #tpu.memory_space<vmem>>, vector<1x1xf32>
    %31 = vector.broadcast %30 : vector<1x1xf32> to vector<1x128xf32>
    %32 = arith.addf %29, %31 : vector<1x128xf32>
    %c0_23 = arith.constant 0 : index
    %c0_24 = arith.constant 0 : index
    %33 = vector.load %arg10[%c0_23, %c0_24] : memref<1x128xf32, #tpu.memory_space<vmem>>, vector<1x128xf32>
    tpu.vector_store %arg10[%c0_23, %c0_24], %32 {strides = array<i32>} : memref<1x128xf32, #tpu.memory_space<vmem>>, vector<1x128xf32>,
    return
  }
  func.func @transform_0(%arg0: i32) -> (i32, i32) {
    %c0_i32 = arith.constant 0 : i32
    %c0_i32_0 = arith.constant 0 : i32
    return %arg0, %c0_i32 : i32, i32
  }
  func.func @transform_1(%arg0: i32) -> (i32, i32) {
    %c0_i32 = arith.constant 0 : i32
    %c0_i32_0 = arith.constant 0 : i32
    %c0_i32_1 = arith.constant 0 : i32
    return %c0_i32, %c0_i32_0 : i32, i32
  }
  func.func @transform_2(%arg0: i32) -> (i32, i32) {
    %c0_i32 = arith.constant 0 : i32
    %c0_i32_0 = arith.constant 0 : i32
    %c0_i32_1 = arith.constant 0 : i32
    return %c0_i32, %c0_i32_0 : i32, i32
  }
  func.func @transform_3(%arg0: i32) -> (i32, i32) {
    %c0_i32 = arith.constant 0 : i32
    %c0_i32_0 = arith.constant 0 : i32
    %c0_i32_1 = arith.constant 0 : i32
    return %c0_i32, %c0_i32_0 : i32, i32
  }
  func.func @transform_4(%arg0: i32) -> (i32, i32) {
    %c0_i32 = arith.constant 0 : i32
    %c0_i32_0 = arith.constant 0 : i32
    %c0_i32_1 = arith.constant 0 : i32
    return %c0_i32, %c0_i32_0 : i32, i32
  }
  func.func @transform_5(%arg0: i32) -> (i32, i32) {
    %c0_i32 = arith.constant 0 : i32
    %c0_i32_0 = arith.constant 0 : i32
    %c0_i32_1 = arith.constant 0 : i32
    return %c0_i32, %c0_i32_0 : i32, i32
  }
  func.func @transform_6(%arg0: i32) -> (i32, i32) {
    %c0_i32 = arith.constant 0 : i32
    %c0_i32_0 = arith.constant 0 : i32
    %c0_i32_1 = arith.constant 0 : i32
    return %c0_i32, %c0_i32_0 : i32, i32
  }
  func.func @transform_7(%arg0: i32) -> (i32, i32) {
    %c0_i32 = arith.constant 0 : i32
    %c0_i32_0 = arith.constant 0 : i32
    %c0_i32_1 = arith.constant 0 : i32
    return %c0_i32, %c0_i32_0 : i32, i32
  }
  func.func @transform_8(%arg0: i32) -> (i32, i32) {
    %c0_i32 = arith.constant 0 : i32
    %c0_i32_0 = arith.constant 0 : i32
    %c0_i32_1 = arith.constant 0 : i32
    return %c0_i32, %c0_i32_0 : i32, i32
  }
  func.func @transform_9(%arg0: i32) -> (i32, i32) {
    %c0_i32 = arith.constant 0 : i32
    %c0_i32_0 = arith.constant 0 : i32
    return %c0_i32, %arg0 : i32, i32
  }
}

</mosaic_0001>

<bundles_post_ra>
// kernel: tpu_custom_call.1
= control target key start
LH: loop header
LB: loop body
LE: loop exit
PB: predicated region body
PF: predicated region fallthrough
CT: control target
= control target key end

     0   :  { %s537_s0 = inlined_call_operand.vmem [shape: f32[8,32], index: 0, kind: input, shape index: {}]   ;;  %s538_s1 = inlined_call_operand.vmem [shape: bf16[16,32], index: 1, kind: input, shape index: {}]   ;;  %s539_s2 = inlined_call_operand.vmem [shape: f32[16,1], index: 2, kind: input, shape index: {}]   ;;  %s540_s3 = inlined_call_operand.vmem [shape: bf16[8,16], index: 3, kind: input, shape index: {}]   ;;  %s541_s4 = inlined_call_operand.vmem [shape: f32[8,1], index: 4, kind: input, shape index: {}]   ;;  %s542_s5 = inlined_call_operand.vmem [shape: bf16[4,8], index: 5, kind: input, shape index: {}]   ;;  %s543_s6 = inlined_call_operand.vmem [shape: f32[4,1], index: 6, kind: input, shape index: {}]   ;;  %s544_s7 = inlined_call_operand.vmem [shape: f32[4,1], index: 7, kind: input, shape index: {}]   ;;  %s545_s8 = inlined_call_operand.<no memory space> [shape: f32[1,1], index: 8, kind: input, shape index: {}]   ;;  %s546_s9 = inlined_call_operand.hbm [shape: f32[1,8], index: 9, kind: output, shape index: {}]  }
   0x1   :  { %v14_v0 = vstv %s545_s8 }
   0x2   :  { %15 = vst [vmem:[#allocation2] sm:$0x1] %v14_v0 }
   0x3   :  { %v50_v1 = vld [vmem:[%s537_s0 + $0x70] sm:$0xff]  ;;  %v51_v2 = vld [vmem:[%s537_s0 + $0x78] sm:$0xff]  ;;  %vm79_vm0 = vcmask 261120   ;;  %v378_v3 = vmov 0.0   ;;  %vm379_vm1 = vmmov 0   ;;  %v48_v5 = vld [vmem:[%s537_s0 + $0x60] sm:$0xff] }
   0x4   :  { %317 = vmatprep.subr.bf16.mxu0 %v378_v3  ;;  %v59_v4 = vpack.c.bf16 %v51_v2, %v50_v1  ;;  %333 = vmatprep.mubr.msk.bf16.mxu0 %vm379_vm1, %v378_v3  ;;  %v49_v6 = vld [vmem:[%s537_s0 + $0x68] sm:$0xff]  ;;  %v380_v7 = vmov 0   ;;  %v62_v10 = vld [vmem:[%s539_s2] sm:$0xff] }
   0x5   :  { %353 = vset.pattern.permute.xlu0 %v380_v7  ;;  %337 = vmatprep.subr.bf16.mxu1 %v378_v3  ;;  %v58_v9 = vpack.c.bf16 %v49_v6, %v48_v5 }
   0x6   :  { %v105_v8 = vsel %vm79_vm0, %v59_v4, 0  ;;  %339 = vmatprep.mubr.msk.bf16.mxu1 %vm379_vm1, %v378_v3  ;;  %354 = vset.pattern.permute.xlu1 %v380_v7 }
   0x7   :  { %318 = vmatpush3.bf16.xpose.msra.mxu0 %v105_v8  ;;  %66 = vperm.xlu0 %353, %v62_v10  }
   0x8   :  { %319 = vmatprep.subr.bf16.mxu0 %v378_v3 }
   0x9   :  { %16 = vsyncpa [#allocation4], 0  ;;  %v63_v11 = vld [vmem:[%s539_s2 + $0x8] sm:$0xff]  ;;  %v102_v12 = vsel %vm79_vm0, %v58_v9, 0  ;;  %v46_v13 = vld [vmem:[%s537_s0 + $0x50] sm:$0xff]  ;;  %vm158_vm2 = vcmask 130048   ;;  %v280_v8 = vlaneseq }
   0xa   :  { %v47_v14 = vld [vmem:[%s537_s0 + $0x58] sm:$0xff]  ;;  %v260_v15 = vld [vmem:[%s544_s7] sm:$0xf]  ;;  %v45_v19 = vld [vmem:[%s537_s0 + $0x48] sm:$0xff]  ;;  %vm215_vm3 = vcmask 1043456   ;;  %vm211_vm4 = vcmask 64512  }
   0xb   :  { %71 = vperm.xlu0 %353, %v63_v11   ;;  %v57_v16 = vpack.c.bf16 %v47_v14, %v46_v13  ;;  %v44_v18 = vld [vmem:[%s537_s0 + $0x40] sm:$0xff]  ;;  %v42_v22 = vld [vmem:[%s537_s0 + $0x30] sm:$0xff]  ;;  %v43_v23 = vld [vmem:[%s537_s0 + $0x38] sm:$0xff] }
   0xc   :  { %v56_v20 = vpack.c.bf16 %v45_v19, %v44_v18  ;;  %v55_v24 = vpack.c.bf16 %v43_v23, %v42_v22  ;;  %v40_v26 = vld [vmem:[%s537_s0 + $0x20] sm:$0xff]  ;;  %v41_v27 = vld [vmem:[%s537_s0 + $0x28] sm:$0xff]  ;;  %v38_v30 = vld [vmem:[%s537_s0 + $0x10] sm:$0xff] }
   0xd   :  { %v99_v17 = vsel %vm79_vm0, %v57_v16, 0  ;;  %v54_v28 = vpack.c.bf16 %v41_v27, %v40_v26  ;;  %v39_v31 = vld [vmem:[%s537_s0 + $0x18] sm:$0xff]  ;;  %v36_v34 = vld [vmem:[%s537_s0] sm:$0xff]  ;;  %v37_v35 = vld [vmem:[%s537_s0 + $0x8] sm:$0xff] }
   0xe   :  { %v96_v21 = vsel %vm79_vm0, %v56_v20, 0  ;;  %v93_v25 = vsel %vm79_vm0, %v55_v24, 0  ;;  %v53_v32 = vpack.c.bf16 %v39_v31, %v38_v30  ;;  %v52_v36 = vpack.c.bf16 %v37_v35, %v36_v34  ;;  %v355_v38 = vld [vmem:[%s538_s1] sm:$0xff]  }
   0xf   :  { %320 = vmatpush3.bf16.xpose.msra.mxu0 %v102_v12  ;;  %263 = vperm.xlu0 %353, %v260_v15   ;;  %v90_v29 = vsel %vm79_vm0, %v54_v28, 0  ;;  %v152_v39 = vld [vmem:[%s541_s4] sm:$0xff]  ;;  %v281_v12 = vshrl.u32 %v280_v8, 7 }
  0x10   :  { %321 = vmatprep.subr.bf16.mxu0 %v378_v3  ;;  %v87_v33 = vsel %vm79_vm0, %v53_v32, 0  ;;  %v84_v37 = vsel %vm79_vm0, %v52_v36, 0  ;;  %155 = vperm.xlu1 %354, %v152_v39   ;;  %v205_v40 = vld [vmem:[%s543_s6] sm:$0xf] }
  0x11   :  { %v274_v41 = vld [vmem:[#allocation2] sm:$0x1]  ;;  %v282_v15 = vsub.s32 0, %v281_v12 }
  0x12   :  { %v150_v53 = vld [vmem:[%s540_s3] sm:$0xf] }
  0x13   :  { %v203_v63 = vld [vmem:[%s542_s5] sm:$0x3]  ;;  %s381_s5 = smov [#allocation3]  }
  0x14   :  { %208 = vperm.xlu1 %354, %v205_v40   ;;  %s292_s28 = sshll.u32 %s381_s5, 4  ;;  %s293_s28 = int_to_ptr.vmem [resolvable:$true] %s292_s28 }
  0x15   :  { %s356_s29 = scalar_lea.vmem %s293_s28, 16  ;;  %s360_s30 = scalar_lea.vmem %s293_s28, 32 }
  0x16   :  { %p357_p0 = scmp.ne.s32.totalorder %s293_s28, %s356_s29  ;;  %p361_p1 = scmp.lt.s32.totalorder %s293_s28, %s293_s28 }
  0x17   :  { %322 = vmatpush3.bf16.xpose.msra.mxu0 %v99_v17  ;;  %p362_p2 = scmp.lt.s32.totalorder %s360_s30, %s356_s29 }
  0x18   :  { %323 = vmatprep.subr.bf16.mxu0 %v378_v3  ;;  %277 = vperm.xlu1 %354, %v274_v41  }
  0x19   :  { %p363_p3 = por %p362_p2, %p361_p1 }
  0x1b   :  { %p364_p4 = pnand %p363_p3, %p357_p0 }
  0x1f   :  { %324 = vmatpush3.bf16.xpose.msra.mxu0 %v96_v21 }
  0x20   :  { %325 = vmatprep.subr.bf16.mxu0 %v378_v3 }
  0x27   :  { %326 = vmatpush3.bf16.xpose.msra.mxu0 %v93_v25 }
  0x28   :  { %327 = vmatprep.subr.bf16.mxu0 %v378_v3 }
  0x2f   :  { %328 = vmatpush3.bf16.xpose.msra.mxu0 %v90_v29 }
  0x30   :  { %329 = vmatprep.subr.bf16.mxu0 %v378_v3 }
  0x37   :  { %330 = vmatpush3.bf16.xpose.msra.mxu0 %v87_v33 }
  0x38   :  { %331 = vmatprep.subr.bf16.mxu0 %v378_v3 }
  0x3f   :  { %332 = vmatpush3.bf16.xpose.msra.mxu0 %v84_v37 }
  0x46   :  { %334 = vmatmul.mubr.msk.bf16.vlgmr.msra.gmra.mxu0 %vm79_vm0, %v355_v38 }
  0x82   :  { %v67_v42 = vpop.permute.xlu0 %66 }
  0x86   :  { %v72_v46 = vpop.permute.xlu0 %71 }
  0x8a   :  { %v264_v5 = vpop.permute.xlu0 %263 }
  0x8b   :  { %v156_v54 = vpop.permute.xlu1 %155 }
  0x8f   :  { %v209_v0 = vpop.permute.xlu1 %208 }
  0x93   :  { %v278_v17 = vpop.permute.xlu1 %277 }
  0x94   :  { %v283_v19 = vrot.slane %v278_v17, %v282_v15 }
 0x106   :  { %v141_v43 = vpop.f32.mrf.mxu0 }
 0x107   :  { %v142_v45 = vadd.f32 %v141_v43, %v67_v42 }
 0x108   :  { %v335_v44 = vpop.f32.mrf.mxu0 }
 0x109   :  { %v148_v50 = vmax.f32 %v142_v45, 0.0 }
 0x10a   :  { %v144_v47 = vpop.f32.mrf.mxu0 }
 0x10b   :  { %v145_v48 = vadd.f32 %v144_v47, %v72_v46 }
 0x10c   :  { %v336_v49 = vpop.f32.mrf.mxu0 }
 0x10d   :  { %v149_v51 = vmax.f32 %v145_v48, 0.0 }
 0x10f   :  { %v151_v52 = vpack.c.bf16 %v149_v51, %v148_v50 }
 0x111   :  { %338 = vmatpush3.bf16.msra.mxu1 %v151_v52 }
 0x112   :  { %343 = vmatprep.subr.bf16.mxu1 %v378_v3 }
 0x114   :  { %340 = vmatmul.mubr.msk.bf16.vlgmr.msra.gmra.mxu1 %vm158_vm2, %v150_v53 }
 0x115   :  { %345 = vmatprep.mubr.msk.bf16.mxu1 %vm379_vm1, %v378_v3 }
 0x1d4   :  { %v196_v55 = vpop.f32.mrf.mxu1 }
 0x1d5   :  { %v197_v56 = vadd.f32 %v196_v55, %v156_v54 }
 0x1d6   :  { %v341_v57 = vpop.f32.mrf.mxu1 }
 0x1d7   :  { %v202_v58 = vmax.f32 %v197_v56, 0.0 }
 0x1d8   :  { %v199_v59 = vpop.f32.mrf.mxu1 }
 0x1d9   :  { %v204_v60 = vpack.c.bf16 %v202_v58, %v202_v58 }
 0x1da   :  { %v342_v61 = vpop.f32.mrf.mxu1 }
 0x1db   :  { %v217_v62 = vsel %vm215_vm3, %v204_v60, 0 }
 0x1dc   :  { %344 = vmatpush3.bf16.msra.mxu1 %v217_v62 }
 0x1df   :  { %346 = vmatmul.mubr.msk.bf16.vlgmr.msra.gmra.mxu1 %vm211_vm4, %v203_v63 }
 0x29f   :  { %v253_v1 = vpop.f32.mrf.mxu1 }
 0x2a0   :  { %v254_v2 = vadd.f32 %v253_v1, %v209_v0 }
 0x2a1   :  { %v347_v3 = vpop.f32.mrf.mxu1 }
 0x2a2   :  { %v259_v4 = vmax.f32 %v254_v2, 0.0 }
 0x2a3   :  { %v256_v6 = vpop.f32.mrf.mxu1 }
 0x2a4   :  { %v266_v7 = vmul.f32 %v264_v5, %v259_v4 }
 0x2a5   :  { %v348_v9 = vpop.f32.mrf.mxu1 }
 0x2a6   :  { %v267_v10 = vsel %vm215_vm3, %v266_v7, 0.0 }
 0x2a7   :  { %v268_v11 = vrot.slane %v267_v10, 4 }
 0x2a9   :  { %v269_v13 = vadd.f32 %v268_v11, %v267_v10 }
 0x2ab   :  { %v270_v14 = vrot.slane %v269_v13, 2 }
 0x2ad   :  { %v271_v16 = vadd.f32 %v270_v14, %v269_v13 }
 0x2af   :  { %v272_v18 = vrot.slane %v271_v16, 1 }
 0x2b1   :  { %v273_v20 = vadd.f32 %v272_v18, %v271_v16 }
 0x2b3   :  { %v284_v21 = vadd.f32 %v283_v19, %v273_v20 }
 0x2b5   :  { %285 = vst [vmem:[#allocation3] sm:$0x1] %v284_v21 }
 0x2b6   :  { %367 = shalt.err (!%p364_p4)
}
 0x2b7   :  { %295 = dma.vmem_to_hbm [thread:$0]  %s293_s28, 16, %s546_s9, [#allocation4]  }
 0x2b8   :  { %376 = dma.done.wait [#allocation4], 16  }
 0x2b9   :  { %377 = vsyncadd [#allocation4], 4294967280 }
 0x2ba   :  { %299 = vsyncpa [#allocation4], 1 }

</bundles_post_ra>
